<compile_context>
chip_gen: v7x
topology: tpu7x:2x2x1
jax: 0.10.0
libtpu: 0.0.40
codegen_flags: <defaults>
</compile_context>

<pallas_src>
import jax
import jax.numpy as jnp
from jax import lax
from jax.experimental import pallas as pl
from jax.experimental.pallas import tpu as pltpu


def _skipgram_fwd_kernel(idx_ref, emb_ref, w_ref, b_ref, out_ref):
    # idx_ref : (B, 1)       int32 block of word indices (VMEM)
    # emb_ref : (vocab, D)   full embedding table, resident in VMEM
    # w_ref   : (D, vocab)   FC weight (already transposed), resident in VMEM
    # b_ref   : (1, vocab)   FC bias, resident in VMEM
    # out_ref : (B, vocab)   logits block
    idx = idx_ref[...]                                    # (B, 1) int32
    bsz = idx.shape[0]
    vocab = emb_ref.shape[0]

    # One-hot gather on the MXU: (B, vocab) @ (vocab, D) -> (B, D)
    iota = lax.broadcasted_iota(jnp.int32, (bsz, vocab), 1)
    onehot = (iota == idx).astype(emb_ref.dtype)          # (B, vocab)
    emb = jnp.dot(onehot, emb_ref[...],
                  preferred_element_type=jnp.float32)     # (B, D) f32

    # Fused FC layer: (B, D) @ (D, vocab) + bias -> logits
    logits = jnp.dot(emb.astype(w_ref.dtype), w_ref[...],
                     preferred_element_type=jnp.float32)  # (B, vocab) f32
    out_ref[...] = (logits + b_ref[...].astype(jnp.float32)).astype(out_ref.dtype)


def _round_up(x: int, m: int) -> int:
    return ((x + m - 1) // m) * m


def skipgram_forward(embeddings: jax.Array,
                     fc_weight: jax.Array,
                     fc_bias: jax.Array,
                     target_word_idx: jax.Array,
                     *,
                     max_block_b: int = 128) -> jax.Array:
    """Pallas equivalent of SkipGramModel.forward.

    embeddings : (vocab, D)      embedding table (nn.Embedding.weight)
    fc_weight  : (vocab, D)      nn.Linear.weight (PyTorch layout)
    fc_bias    : (vocab,)        nn.Linear.bias
    target_word_idx : int array of any shape
    returns    : logits of shape target_word_idx.shape + (vocab,)
    """
    vocab_size, emb_dim = embeddings.shape
    assert fc_weight.shape == (vocab_size, emb_dim)
    assert fc_bias.shape == (vocab_size,)

    out_dtype = embeddings.dtype
    w_t = fc_weight.T.astype(out_dtype)                    # (D, vocab)
    b2d = fc_bias.reshape(1, vocab_size).astype(out_dtype)

    idx_flat = target_word_idx.reshape(-1).astype(jnp.int32)
    # Bounds safety: clamp instead of driving an OOB gather.
    idx_flat = jnp.clip(idx_flat, 0, vocab_size - 1)
    n = idx_flat.shape[0]

    # Adaptive batch block: big enough to amortize per-step overhead and feed
    # the MXU, small enough that tiny batches are a single grid step.
    block_b = min(max_block_b, _round_up(max(n, 1), 8))
    n_blocks = pl.cdiv(n, block_b)
    n_pad = n_blocks * block_b
    if n_pad != n:
        idx_flat = jnp.pad(idx_flat, (0, n_pad - n))
    idx2d = idx_flat.reshape(n_pad, 1)

    # VMEM gate: keep everything resident only if it comfortably fits even the
    # smallest physical VMEM (v7x: 64 MiB). Factor of 2 covers double-buffering.
    itemsize = jnp.dtype(out_dtype).itemsize
    resident_bytes = (embeddings.size + w_t.size + b2d.size) * itemsize
    per_step_bytes = block_b * 1 * 4 + block_b * vocab_size * itemsize
    needed = 2 * (resident_bytes + per_step_bytes) + (2 << 20)
    VMEM_SAFE_BUDGET = 48 << 20
    if needed > VMEM_SAFE_BUDGET:
        # TODO(synk): blocked/double-buffered fallback for tables too large for VMEM.
        raise NotImplementedError("embedding/FC tables too large for VMEM-resident path")

    out = pl.pallas_call(
        _skipgram_fwd_kernel,
        grid=(n_blocks,),
        in_specs=[
            pl.BlockSpec((block_b, 1), lambda i: (i, 0)),              # indices
            pl.BlockSpec((vocab_size, emb_dim), lambda i: (0, 0)),     # table (resident)
            pl.BlockSpec((emb_dim, vocab_size), lambda i: (0, 0)),     # W^T  (resident)
            pl.BlockSpec((1, vocab_size), lambda i: (0, 0)),           # bias (resident)
        ],
        out_specs=pl.BlockSpec((block_b, vocab_size), lambda i: (i, 0)),
        out_shape=jax.ShapeDtypeStruct((n_pad, vocab_size), out_dtype),
        compiler_params=pltpu.CompilerParams(
            dimension_semantics=("parallel",),
            vmem_limit_bytes=max(int(needed), 16 << 20)),
    )(idx2d, embeddings, w_t, b2d)

    out = out[:n]
    return out.reshape(target_word_idx.shape + (vocab_size,))


if __name__ == "__main__":
    key = jax.random.PRNGKey(0)
    vocab_size = 256
    embedding_dim = 128

    k_emb, k_w, k_b = jax.random.split(key, 3)
    embeddings = jax.random.normal(k_emb, (vocab_size, embedding_dim), dtype=jnp.float32)
    fc_weight = jax.random.normal(k_w, (vocab_size, embedding_dim), dtype=jnp.float32) * 0.05
    fc_bias = jax.random.normal(k_b, (vocab_size,), dtype=jnp.float32) * 0.05

    # 10 indices -> exercises padding to a multiple of the batch block.
    target_word_idx = jnp.array([1, 0, 5, 31, 7, 1, 16, 2, 200, 9], dtype=jnp.int32)

    logits = skipgram_forward(embeddings, fc_weight, fc_bias, target_word_idx)
    logits = jax.block_until_ready(logits)

    # Reference: embedding gather + linear layer (PyTorch semantics).
    ref = embeddings[target_word_idx] @ fc_weight.T + fc_bias
    assert logits.shape == (target_word_idx.shape[0], vocab_size)
    assert logits.dtype == embeddings.dtype
    assert bool(jnp.allclose(logits, ref, atol=1e-3, rtol=1e-3)), "mismatch vs reference"

    # Single-index case.
    single = jax.block_until_ready(
        skipgram_forward(embeddings, fc_weight, fc_bias, jnp.array([1], dtype=jnp.int32)))
    ref1 = embeddings[jnp.array([1])] @ fc_weight.T + fc_bias
    assert bool(jnp.allclose(single, ref1, atol=1e-3, rtol=1e-3))

    # Larger batch (exercises multi-block grid with block_b=128).
    k_idx = jax.random.PRNGKey(7)
    big_idx = jax.random.randint(k_idx, (300,), 0, vocab_size, dtype=jnp.int32)
    big = jax.block_until_ready(skipgram_forward(embeddings, fc_weight, fc_bias, big_idx))
    ref_big = embeddings[big_idx] @ fc_weight.T + fc_bias
    assert bool(jnp.allclose(big, ref_big, atol=1e-3, rtol=1e-3))

    print("KERNEL_OK")
</pallas_src>

<mosaic_0001>
module attributes {stable_mosaic.version = 11 : i64} {
  func.func @_skipgram_fwd_kernel(%arg0: i32, %arg1: memref<16x1xi32, #tpu.memory_space<vmem>>, %arg2: memref<256x128xf32, #tpu.memory_space<vmem>>, %arg3: memref<128x256xf32, #tpu.memory_space<vmem>>, %arg4: memref<1x256xf32, #tpu.memory_space<vmem>>, %arg5: memref<16x256xf32, #tpu.memory_space<vmem>>) attributes {dimension_semantics = [#tpu.dimension_semantics<parallel>], iteration_bounds = array<i64: 1>, scalar_prefetch = 0 : i64, scratch_operands = 0 : i64, tpu.core_type = #tpu.core_type<tc>, window_params = [{transform_indices = @transform_0, window_bounds = array<i64: 16, 1>}, {pipeline_mode = #tpu.pipeline_mode<synchronous>, transform_indices = @transform_1, window_bounds = array<i64: 256, 128>}, {pipeline_mode = #tpu.pipeline_mode<synchronous>, transform_indices = @transform_2, window_bounds = array<i64: 128, 256>}, {pipeline_mode = #tpu.pipeline_mode<synchronous>, transform_indices = @transform_3, window_bounds = array<i64: 1, 256>}, {transform_indices = @transform_4, window_bounds = array<i64: 16, 256>}]} {
    %c0 = arith.constant 0 : index
    %c0_0 = arith.constant 0 : index
    %0 = vector.load %arg1[%c0, %c0_0] : memref<16x1xi32, #tpu.memory_space<vmem>>, vector<16x1xi32>
    %1 = tpu.iota {dimensions = array<i32: 1>} : vector<16x256xi32>
    %2 = vector.broadcast %0 : vector<16x1xi32> to vector<16x256xi32>
    %3 = arith.cmpi eq, %1, %2 : vector<16x256xi32>
    %4 = arith.extui %3 : vector<16x256xi1> to vector<16x256xi32>
    %5 = arith.sitofp %4 : vector<16x256xi32> to vector<16x256xf32>
    %c0_1 = arith.constant 0 : index
    %c0_2 = arith.constant 0 : index
    %6 = vector.load %arg2[%c0_1, %c0_2] : memref<256x128xf32, #tpu.memory_space<vmem>>, vector<256x128xf32>
    %cst = arith.constant dense<0.000000e+00> : vector<16x128xf32>
    %7 = tpu.matmul %5, %6, %cst {dimension_numbers = #tpu.dot_dimension_numbers<[1], [0], [0], [1], [0, 0, 1, 1], [], []>} : vector<16x256xf32>, vector<256x128xf32>, vector<16x128xf32> -> vector<16x128xf32>
    %c0_3 = arith.constant 0 : index
    %c0_4 = arith.constant 0 : index
    %8 = vector.load %arg3[%c0_3, %c0_4] : memref<128x256xf32, #tpu.memory_space<vmem>>, vector<128x256xf32>
    %cst_5 = arith.constant dense<0.000000e+00> : vector<16x256xf32>
    %9 = tpu.matmul %7, %8, %cst_5 {dimension_numbers = #tpu.dot_dimension_numbers<[1], [0], [0], [1], [0, 0, 1, 1], [], []>} : vector<16x128xf32>, vector<128x256xf32>, vector<16x256xf32> -> vector<16x256xf32>
    %c0_6 = arith.constant 0 : index
    %c0_7 = arith.constant 0 : index
    %10 = vector.load %arg4[%c0_6, %c0_7] : memref<1x256xf32, #tpu.memory_space<vmem>>, vector<1x256xf32>
    %11 = vector.broadcast %10 : vector<1x256xf32> to vector<16x256xf32>
    %12 = arith.addf %9, %11 : vector<16x256xf32>
    %c0_8 = arith.constant 0 : index
    %c0_9 = arith.constant 0 : index
    %13 = vector.load %arg5[%c0_8, %c0_9] : memref<16x256xf32, #tpu.memory_space<vmem>>, vector<16x256xf32>
    tpu.vector_store %arg5[%c0_8, %c0_9], %12 {strides = array<i32>} : memref<16x256xf32, #tpu.memory_space<vmem>>, vector<16x256xf32>,
    return
  }
  func.func @transform_0(%arg0: i32) -> (i32, i32) {
    %c0_i32 = arith.constant 0 : i32
    %c0_i32_0 = arith.constant 0 : i32
    return %arg0, %c0_i32 : i32, i32
  }
  func.func @transform_1(%arg0: i32) -> (i32, i32) {
    %c0_i32 = arith.constant 0 : i32
    %c0_i32_0 = arith.constant 0 : i32
    %c0_i32_1 = arith.constant 0 : i32
    return %c0_i32, %c0_i32_0 : i32, i32
  }
  func.func @transform_2(%arg0: i32) -> (i32, i32) {
    %c0_i32 = arith.constant 0 : i32
    %c0_i32_0 = arith.constant 0 : i32
    %c0_i32_1 = arith.constant 0 : i32
    return %c0_i32, %c0_i32_0 : i32, i32
  }
  func.func @transform_3(%arg0: i32) -> (i32, i32) {
    %c0_i32 = arith.constant 0 : i32
    %c0_i32_0 = arith.constant 0 : i32
    %c0_i32_1 = arith.constant 0 : i32
    return %c0_i32, %c0_i32_0 : i32, i32
  }
  func.func @transform_4(%arg0: i32) -> (i32, i32) {
    %c0_i32 = arith.constant 0 : i32
    %c0_i32_0 = arith.constant 0 : i32
    return %arg0, %c0_i32 : i32, i32
  }
}

</mosaic_0001>

<bundles_post_ra>
// kernel: tpu_custom_call.1
= control target key start
LH: loop header
LB: loop body
LE: loop exit
PB: predicated region body
PF: predicated region fallthrough
CT: control target
= control target key end

     0   :  { %9 = vsyncpa [#allocation3], 0  ;;  %s598_s0 = inlined_call_operand.vmem [shape: s32[16,1], index: 0, kind: input, shape index: {}]   ;;  %s599_s1 = inlined_call_operand.hbm [shape: f32[256,128], index: 1, kind: input, shape index: {}]   ;;  %s600_s2 = inlined_call_operand.hbm [shape: f32[128,256], index: 2, kind: input, shape index: {}]   ;;  %s601_s3 = inlined_call_operand.vmem [shape: f32[1,256], index: 3, kind: input, shape index: {}]   ;;  %s602_s4 = inlined_call_operand.hbm [shape: f32[16,256], index: 4, kind: output, shape index: {}]  }
   0x1   :  { %10 = vsyncpa [#allocation6], 0 }
   0x2   :  { %11 = vsyncpa [#allocation4], 0  ;;  %s512_s15 = smov [#allocation2]   ;;  %s440_s19 = scalar_lea.hbm %s599_s1, 4096 }
   0x3   :  { %s19_s16 = sshll.u32 %s512_s15, 4  ;;  %p441_p0 = scmp.ne.s32.totalorder %s599_s1, %s440_s19  ;;  %s20_s16 = int_to_ptr.vmem [resolvable:$true] %s19_s16 }
   0x4   :  { %p444_p1 = scmp.lt.u32.totalorder %s440_s19, %s599_s1 }
   0x6   :  { %p446_p2 = pnand %p444_p1, %p441_p0 }
   0x8   :  { %449 = shalt.err (!%p446_p2)
}
   0x9   :  { %s450_s24 = scalar_lea.vmem %s20_s16, 4096  ;;  %p455_p4 = scmp.lt.s32.totalorder %s20_s16, %s20_s16 }
   0xa   :  { %p451_p3 = scmp.ne.s32.totalorder %s20_s16, %s450_s24  ;;  %p456_p5 = scmp.lt.s32.totalorder %s450_s24, %s450_s24 }
   0xc   :  { %p457_p6 = por %p456_p5, %p455_p4 }
   0xe   :  { %p458_p7 = pnand %p457_p6, %p451_p3 }
  0x10   :  { %461 = shalt.err (!%p458_p7)
}
  0x11   :  { %s513_s25 = smov 128   ;;  %s514_s26 = smov 8  }
  0x12   :  { %25 = dma.hbm_to_vmem [thread:$0]  %s599_s1, 4096, %s20_s16, [#allocation3], %s513_s25, %s513_s25, %s514_s26  }
  0x13   :  { %s515_s29 = smov [#allocation5]   ;;  %s462_s7 = scalar_lea.hbm %s600_s2, 4096 }
  0x14   :  { %s31_s30 = sshll.u32 %s515_s29, 4  ;;  %p463_p8 = scmp.ne.s32.totalorder %s600_s2, %s462_s7  ;;  %s32_s30 = int_to_ptr.vmem [resolvable:$true] %s31_s30 }
  0x15   :  { %p466_p9 = scmp.lt.u32.totalorder %s462_s7, %s600_s2 }
  0x17   :  { %p468_p10 = pnand %p466_p9, %p463_p8 }
  0x19   :  { %471 = shalt.err (!%p468_p10)
}
  0x1a   :  { %s472_s12 = scalar_lea.vmem %s32_s30, 4096  ;;  %p477_p12 = scmp.lt.s32.totalorder %s32_s30, %s32_s30 }
  0x1b   :  { %p473_p11 = scmp.ne.s32.totalorder %s32_s30, %s472_s12  ;;  %p478_p13 = scmp.lt.s32.totalorder %s472_s12, %s472_s12 }
  0x1d   :  { %p479_p0 = por %p478_p13, %p477_p12 }
  0x1f   :  { %p480_p1 = pnand %p479_p0, %p473_p11 }
  0x21   :  { %483 = shalt.err (!%p480_p1)
}
  0x22   :  { %s516_s1 = smov 256   ;;  %s517_s13 = smov 16  }
  0x23   :  { %37 = dma.hbm_to_vmem [thread:$0]  %s600_s2, 4096, %s32_s30, [#allocation6], %s516_s1, %s516_s1, %s517_s13  }
  0x24   :  { %506 = dma.done.wait [#allocation3], 4096  }
  0x25   :  { %507 = vsyncadd [#allocation3], 4294963200 }
  0x26   :  { %508 = dma.done.wait [#allocation6], 4096  }
  0x27   :  { %509 = vsyncadd [#allocation6], 4294963200  ;;  %v518_v0 = vmov 0   ;;  %v46_v1 = vld [vmem:[%s598_s0] sm:$0xff]  ;;  %v47_v2 = vld [vmem:[%s598_s0 + $0x8] sm:$0xff]  ;;  %s521_s20 = smov [#allocation7]  }
  0x28   :  { %439 = vset.pattern.permute.xlu0 %v518_v0  ;;  %v85_v3 = vld [vmem:[#allocation2 + $0x80] sm:$0xff]  ;;  %v86_v4 = vld [vmem:[#allocation2 + $0x88] sm:$0xff]  ;;  %v87_v9 = vld [vmem:[#allocation2 + $0x90] sm:$0xff]  ;;  %s306_s21 = sshll.u32 %s521_s20, 4  ;;  %s307_s21 = int_to_ptr.vmem [resolvable:$true] %s306_s21 }
  0x29   :  { %52 = vperm.xlu0 %439, %v46_v1   ;;  %v69_v5 = vld [vmem:[#allocation2] sm:$0xff]  ;;  %v70_v6 = vld [vmem:[#allocation2 + $0x8] sm:$0xff]  ;;  %v365_v7 = vpack.c.bf16 %v86_v4, %v85_v3  ;;  %v88_v10 = vld [vmem:[#allocation2 + $0x98] sm:$0xff]  ;;  %s484_s22 = scalar_lea.vmem %s307_s21, 512  ;;  %p489_p3 = scmp.lt.s32.totalorder %s307_s21, %s307_s21 }
  0x2a   :  { %v367_v8 = vpack.c.bf16 %v70_v6, %v69_v5  ;;  %v71_v11 = vld [vmem:[#allocation2 + $0x10] sm:$0xff]  ;;  %v369_v12 = vpack.c.bf16 %v88_v10, %v87_v9  ;;  %v72_v13 = vld [vmem:[#allocation2 + $0x18] sm:$0xff]  ;;  %v89_v14 = vld [vmem:[#allocation2 + $0xa0] sm:$0xff]  ;;  %p485_p2 = scmp.ne.s32.totalorder %s307_s21, %s484_s22  ;;  %p490_p4 = scmp.lt.s32.totalorder %s484_s22, %s484_s22 }
  0x2b   :  { %v90_v15 = vld [vmem:[#allocation2 + $0xa8] sm:$0xff]  ;;  %366 = vmatprep.subr.bf16.mxu0 %v365_v7  ;;  %v371_v16 = vpack.c.bf16 %v72_v13, %v71_v11  ;;  %v73_v18 = vld [vmem:[#allocation2 + $0x20] sm:$0xff]  ;;  %v91_v20 = vld [vmem:[#allocation2 + $0xb0] sm:$0xff] }
  0x2c   :  { %368 = vmatpush3.bf16.msra.mxu0 %v367_v8  ;;  %v373_v17 = vpack.c.bf16 %v90_v15, %v89_v14  ;;  %v74_v19 = vld [vmem:[#allocation2 + $0x28] sm:$0xff]  ;;  %v92_v21 = vld [vmem:[#allocation2 + $0xb8] sm:$0xff]  ;;  %v75_v24 = vld [vmem:[#allocation2 + $0x30] sm:$0xff]  ;;  %p491_p5 = por %p490_p4, %p489_p3 }
  0x2d   :  { %55 = vperm.xlu0 %439, %v47_v2   ;;  %370 = vmatprep.subr.bf16.mxu0 %v369_v12  ;;  %v375_v22 = vpack.c.bf16 %v74_v19, %v73_v18  ;;  %v377_v23 = vpack.c.bf16 %v92_v21, %v91_v20  ;;  %v76_v25 = vld [vmem:[#allocation2 + $0x38] sm:$0xff]  ;;  %v93_v26 = vld [vmem:[#allocation2 + $0xc0] sm:$0xff]  ;;  %v94_v27 = vld [vmem:[#allocation2 + $0xc8] sm:$0xff] }
  0x2e   :  { %v177_v28 = vld [vmem:[#allocation5 + $0x8] sm:$0xff]  ;;  %v179_v29 = vld [vmem:[#allocation5 + $0x18] sm:$0xff]  ;;  %v77_v30 = vld [vmem:[#allocation2 + $0x40] sm:$0xff]  ;;  %v379_v35 = vpack.c.bf16 %v76_v25, %v75_v24  ;;  %v381_v40 = vpack.c.bf16 %v94_v27, %v93_v26  ;;  %p492_p6 = pnand %p491_p5, %p485_p2 }
  0x2f   :  { %v397_v31 = vpack.c.bf16 %v179_v29, %v177_v28  ;;  %v176_v32 = vld [vmem:[#allocation5] sm:$0xff]  ;;  %v178_v33 = vld [vmem:[#allocation5 + $0x10] sm:$0xff]  ;;  %v181_v34 = vld [vmem:[#allocation5 + $0x28] sm:$0xff]  ;;  %v48_v29 = vlaneseq }
  0x30   :  { %372 = vmatpush3.bf16.msra.mxu0 %v371_v16  ;;  %v399_v36 = vpack.c.bf16 %v178_v33, %v176_v32  ;;  %v183_v37 = vld [vmem:[#allocation5 + $0x38] sm:$0xff]  ;;  %v180_v38 = vld [vmem:[#allocation5 + $0x20] sm:$0xff]  ;;  %v182_v39 = vld [vmem:[#allocation5 + $0x30] sm:$0xff]  ;;  %v519_v33 = vmov 1.0  }
  0x31   :  { %374 = vmatprep.subr.bf16.mxu0 %v373_v17  ;;  %v78_v41 = vld [vmem:[#allocation2 + $0x48] sm:$0xff]  ;;  %398 = vmatprep.subr.bf16.mxu1 %v397_v31  ;;  %v401_v42 = vpack.c.bf16 %v183_v37, %v181_v34  ;;  %v187_v44 = vld [vmem:[#allocation5 + $0x58] sm:$0xff]  ;;  %v95_v45 = vld [vmem:[#allocation2 + $0xd0] sm:$0xff]  ;;  %v403_v47 = vpack.c.bf16 %v182_v39, %v180_v38 }
  0x32   :  { %v185_v43 = vld [vmem:[#allocation5 + $0x48] sm:$0xff]  ;;  %v96_v46 = vld [vmem:[#allocation2 + $0xd8] sm:$0xff]  ;;  %400 = vmatpush1.bf16.msra.mxu1 %v399_v36  ;;  %v184_v49 = vld [vmem:[#allocation5 + $0x40] sm:$0xff]  ;;  %v383_v51 = vpack.c.bf16 %v78_v41, %v77_v30  ;;  %v49_v30 = vand.u32 127, %v48_v29  ;;  %v520_v41 = vmov 0.0  }
  0x33   :  { %402 = vmatprep.subr.bf16.mxu1 %v401_v42  ;;  %v405_v48 = vpack.c.bf16 %v187_v44, %v185_v43  ;;  %v186_v50 = vld [vmem:[#allocation5 + $0x50] sm:$0xff]  ;;  %v189_v52 = vld [vmem:[#allocation5 + $0x68] sm:$0xff]  ;;  %v191_v53 = vld [vmem:[#allocation5 + $0x78] sm:$0xff]  ;;  %v385_v54 = vpack.c.bf16 %v96_v46, %v95_v45  ;;  %284 = vmatprep.mubr.f32.mxu1 %v520_v41 }
  0x34   :  { %376 = vmatpush3.bf16.msra.mxu0 %v375_v22  ;;  %v79_v55 = vld [vmem:[#allocation2 + $0x50] sm:$0xff]  ;;  %v80_v56 = vld [vmem:[#allocation2 + $0x58] sm:$0xff]  ;;  %v97_v57 = vld [vmem:[#allocation2 + $0xe0] sm:$0xff]  ;;  %v407_v59 = vpack.c.bf16 %v186_v50, %v184_v49  ;;  %v409_v60 = vpack.c.bf16 %v191_v53, %v189_v52  ;;  %v50_v31 = vadd.s32 128, %v49_v30 }
  0x35   :  { %378 = vmatprep.subr.bf16.mxu0 %v377_v23  ;;  %v98_v58 = vld [vmem:[#allocation2 + $0xe8] sm:$0xff]  ;;  %v188_v61 = vld [vmem:[#allocation5 + $0x60] sm:$0xff]  ;;  %v190_v62 = vld [vmem:[#allocation5 + $0x70] sm:$0xff]  ;;  %v387_v63 = vpack.c.bf16 %v80_v56, %v79_v55 }
  0x36   :  { %404 = vmatpush1.bf16.msra.mxu1 %v403_v47  ;;  %v193_v0 = vld [vmem:[#allocation5 + $0x88] sm:$0xff]  ;;  %v195_v1 = vld [vmem:[#allocation5 + $0x98] sm:$0xff]  ;;  %v389_v2 = vpack.c.bf16 %v98_v58, %v97_v57  ;;  %v81_v3 = vld [vmem:[#allocation2 + $0x60] sm:$0xff]  ;;  %v411_v7 = vpack.c.bf16 %v190_v62, %v188_v61 }
  0x37   :  { %406 = vmatprep.subr.bf16.mxu1 %v405_v48  ;;  %v82_v4 = vld [vmem:[#allocation2 + $0x68] sm:$0xff]  ;;  %v99_v5 = vld [vmem:[#allocation2 + $0xf0] sm:$0xff]  ;;  %v100_v6 = vld [vmem:[#allocation2 + $0xf8] sm:$0xff]  ;;  %v413_v8 = vpack.c.bf16 %v195_v1, %v193_v0  ;;  %v211_v48 = vshrl.u32 %v48_v29, 7 }
  0x38   :  { %380 = vmatpush3.bf16.msra.mxu0 %v379_v35  ;;  %v192_v9 = vld [vmem:[#allocation5 + $0x80] sm:$0xff]  ;;  %v194_v10 = vld [vmem:[#allocation5 + $0x90] sm:$0xff]  ;;  %v391_v11 = vpack.c.bf16 %v82_v4, %v81_v3  ;;  %v197_v12 = vld [vmem:[#allocation5 + $0xa8] sm:$0xff]  ;;  %v393_v14 = vpack.c.bf16 %v100_v6, %v99_v5 }
  0x39   :  { %382 = vmatprep.subr.bf16.mxu0 %v381_v40  ;;  %v199_v13 = vld [vmem:[#allocation5 + $0xb8] sm:$0xff]  ;;  %v83_v15 = vld [vmem:[#allocation2 + $0x70] sm:$0xff]  ;;  %v415_v17 = vpack.c.bf16 %v194_v10, %v192_v9  ;;  %v196_v19 = vld [vmem:[#allocation5 + $0xa0] sm:$0xff]  ;;  %v212_v49 = vsub.s32 0, %v211_v48 }
  0x3a   :  { %408 = vmatpush1.bf16.msra.mxu1 %v407_v59  ;;  %v84_v16 = vld [vmem:[#allocation2 + $0x78] sm:$0xff]  ;;  %v417_v18 = vpack.c.bf16 %v199_v13, %v197_v12  ;;  %v198_v20 = vld [vmem:[#allocation5 + $0xb0] sm:$0xff]  ;;  %v201_v22 = vld [vmem:[#allocation5 + $0xc8] sm:$0xff] }
  0x3b   :  { %410 = vmatprep.subr.bf16.mxu1 %v409_v60  ;;  %v395_v21 = vpack.c.bf16 %v84_v16, %v83_v15  ;;  %v203_v23 = vld [vmem:[#allocation5 + $0xd8] sm:$0xff]  ;;  %v419_v24 = vpack.c.bf16 %v198_v20, %v196_v19  ;;  %v200_v26 = vld [vmem:[#allocation5 + $0xc0] sm:$0xff]  ;;  %v202_v27 = vld [vmem:[#allocation5 + $0xd0] sm:$0xff] }
  0x3c   :  { %384 = vmatpush3.bf16.msra.mxu0 %v383_v51  ;;  %v421_v25 = vpack.c.bf16 %v203_v23, %v201_v22  ;;  %v423_v28 = vpack.c.bf16 %v202_v27, %v200_v26  ;;  %v205_v35 = vld [vmem:[#allocation5 + $0xe8] sm:$0xff]  ;;  %v207_v36 = vld [vmem:[#allocation5 + $0xf8] sm:$0xff]  ;;  %v204_v38 = vld [vmem:[#allocation5 + $0xe0] sm:$0xff]  ;;  %v216_v51 = vsub.s32 1, %v211_v48 }
  0x3d   :  { %386 = vmatprep.subr.bf16.mxu0 %v385_v54  ;;  %v425_v37 = vpack.c.bf16 %v207_v36, %v205_v35  ;;  %v206_v39 = vld [vmem:[#allocation5 + $0xf0] sm:$0xff]  ;;  %v208_v50 = vld [vmem:[%s601_s3] sm:$0x3] }
  0x3e   :  { %412 = vmatpush1.bf16.msra.mxu1 %v411_v7  ;;  %v427_v40 = vpack.c.bf16 %v206_v39, %v204_v38  ;;  %v213_v52 = vrot.slane %v208_v50, %v212_v49  ;;  %v217_v53 = vrot.slane %v208_v50, %v216_v51 }
  0x3f   :  { %414 = vmatprep.subr.bf16.mxu1 %v413_v8 }
  0x40   :  { %388 = vmatpush3.bf16.msra.mxu0 %v387_v63 }
  0x41   :  { %390 = vmatprep.subr.bf16.mxu0 %v389_v2 }
  0x42   :  { %416 = vmatpush1.bf16.msra.mxu1 %v415_v17 }
  0x43   :  { %418 = vmatprep.subr.bf16.mxu1 %v417_v18 }
  0x44   :  { %392 = vmatpush3.bf16.msra.mxu0 %v391_v11 }
  0x45   :  { %394 = vmatprep.subr.bf16.mxu0 %v393_v14 }
  0x46   :  { %420 = vmatpush1.bf16.msra.mxu1 %v419_v24 }
  0x47   :  { %422 = vmatprep.subr.bf16.mxu1 %v421_v25 }
  0x48   :  { %396 = vmatpush3.bf16.msra.mxu0 %v395_v21 }
  0x4a   :  { %424 = vmatpush1.bf16.msra.mxu1 %v423_v28 }
  0x4b   :  { %426 = vmatprep.subr.bf16.mxu1 %v425_v37 }
  0x4e   :  { %428 = vmatpush1.bf16.msra.mxu1 %v427_v40 }
  0xa8   :  { %v53_v32 = vpop.permute.xlu0 %52 }
  0xa9   :  { %vm57_vm0 = vcmp.eq.s32.totalorder %v49_v30, %v53_v32  ;;  %vm58_vm1 = vcmp.eq.s32.totalorder %v50_v31, %v53_v32 }
  0xaa   :  { %323 = vmatprep.mubr.msk.f32.mxu0 %vm58_vm1, %v519_v33 }
  0xab   :  { %324 = vmatmul.mubr.msk.f32.vlgmr.msra.gmra.mrb[0].mxu0 %vm57_vm0, %v519_v33 }
  0xac   :  { %v56_v34 = vpop.permute.xlu0 %55 }
  0xad   :  { %vm59_vm2 = vcmp.eq.s32.totalorder %v49_v30, %v56_v34  ;;  %vm60_vm3 = vcmp.eq.s32.totalorder %v50_v31, %v56_v34 }
  0xae   :  { %325 = vmatprep.mubr.msk.f32.mxu0 %vm60_vm3, %v519_v33 }
  0xaf   :  { %326 = vmatmul.mubr.msk.f32.gmra.mrb[2].mxu0 %vm59_vm2, %v519_v33 }
 0x17e   :  { %v359_v42 = vpop.f32.mrb[0].mxu0 }
 0x17f   :  { %v360_v43 = vpop.f32.mrb[1].mxu0 }
 0x180   :  { %v361_v44 = vadd.f32 %v360_v43, %v359_v42 }
 0x182   :  { %v362_v45 = vpop.f32.mrb[2].mxu0  ;;  %285 = vmatmul.mubr.f32.vlgmr.msra.gmra.mrb[0].mxu1 %v361_v44 }
 0x183   :  { %v363_v46 = vpop.f32.mrb[3].mxu0  ;;  %290 = vmatprep.mubr.f32.mxu1 %v520_v41 }
 0x184   :  { %v364_v47 = vadd.f32 %v363_v46, %v362_v45 }
 0x186   :  { %291 = vmatmul.mubr.f32.gmra.mrb[2].mxu1 %v364_v47 }
 0x255   :  { %v286_v54 = vpop.f32.mrb[0].mxu1 }
 0x256   :  { %v287_v55 = vadd.f32 %v286_v54, %v213_v52  ;;  %v288_v56 = vpop.f32.mrb[1].mxu1 }
 0x257   :  { %v289_v57 = vadd.f32 %v288_v56, %v217_v53 }
 0x258   :  { %297 = vst [vmem:[#allocation7] sm:$0xff] %v287_v55 }
 0x259   :  { %298 = vst [vmem:[#allocation7 + $0x8] sm:$0xff] %v289_v57  ;;  %v292_v58 = vpop.f32.mrb[2].mxu1 }
 0x25a   :  { %v293_v59 = vadd.f32 %v292_v58, %v213_v52  ;;  %v294_v60 = vpop.f32.mrb[3].mxu1 }
 0x25b   :  { %v295_v61 = vadd.f32 %v294_v60, %v217_v53 }
 0x25c   :  { %299 = vst [vmem:[#allocation7 + $0x10] sm:$0xff] %v293_v59 }
 0x25d   :  { %300 = vst [vmem:[#allocation7 + $0x18] sm:$0xff] %v295_v61 }
 0x25e   :  { %495 = shalt.err (!%p492_p6)
}
 0x25f   :  { %s496_s24 = scalar_lea.hbm %s602_s4, 512 }
 0x260   :  { %p497_p7 = scmp.ne.s32.totalorder %s602_s4, %s496_s24  ;;  %p500_p8 = scmp.lt.u32.totalorder %s496_s24, %s602_s4 }
 0x262   :  { %p502_p9 = pnand %p500_p8, %p497_p7 }
 0x264   :  { %505 = shalt.err (!%p502_p9)
}
 0x265   :  { %312 = dma.vmem_to_hbm [thread:$0]  %s307_s21, 512, %s602_s4, [#allocation4], %s516_s1, %s516_s1, %s517_s13  }
 0x266   :  { %510 = dma.done.wait [#allocation4], 512  }
 0x267   :  { %511 = vsyncadd [#allocation4], 4294966784 }
 0x268   :  { %316 = vsyncpa [#allocation3], 1 }
 0x269   :  { %317 = vsyncpa [#allocation6], 1 }
 0x26a   :  { %318 = vsyncpa [#allocation4], 1 }

</bundles_post_ra>
